<compile_context>
chip_gen: v5e
topology: v5e:2x2
jax: 0.10.0
libtpu: 0.0.40
codegen_flags: <defaults>
</compile_context>

<pallas_src>
import math

import jax
import jax.numpy as jnp
from jax.experimental import pallas as pl
from jax.experimental.pallas import tpu as pltpu


def _round_up(a, b):
    return ((a + b - 1) // b) * b


def _default_tile_m():
    """Row-tile (in 128-wide row groups) fitting each generation's default
    scoped-VMEM limit without raising vmem_limit_bytes:
      v5e (16 MiB scoped) / v7x (32 MiB of 64 MiB): 2048 -> ~8 MiB double-buffered
      v6e (32 MiB of 128 MiB)                     : 4096 -> ~16 MiB double-buffered
    """
    try:
        kind = jax.devices()[0].device_kind.lower()
    except Exception:
        return 2048
    if "v6" in kind:
        return 4096
    return 2048


# ----------------------------------------------------------------------------
# Kernel: folded affine 3 -> 1, fully lane-dense.
#   x_ref  : (3, TILE_M, 128) VMEM (f32 or bf16; feature-major, rows lane-dense)
#   wb_ref : (4,)             f32 SMEM  [w0, w1, w2, bias] of the folded map
#   out_ref: (TILE_M, 128)    f32 VMEM
# Three VPU FMAs per output vreg; purely HBM-bandwidth-bound.
# ----------------------------------------------------------------------------
def fused_affine_kernel(x_ref, wb_ref, out_ref):
    x0 = x_ref[0].astype(jnp.float32)
    x1 = x_ref[1].astype(jnp.float32)
    x2 = x_ref[2].astype(jnp.float32)
    out_ref[...] = x0 * wb_ref[0] + x1 * wb_ref[1] + x2 * wb_ref[2] + wb_ref[3]


def fused_mlp_forward(x2d, wb, *, tile_m=None):
    """y = x2d @ W_fused + b_fused, lane-dense, tiled 1-D parallel grid.

    x2d: (N, 3) f32/bf16.  wb: (4,) f32 = [W_fused[0..2], b_fused].
    Returns (N, 1) f32.
    """
    n = x2d.shape[0]
    if tile_m is None:
        tile_m = _default_tile_m()

    m_needed = pl.cdiv(n, 128)                 # lane-dense row groups of 128
    m_total = _round_up(m_needed, 8)           # pad rows only to a sublane multiple
    tile_m = max(8, min(_round_up(tile_m, 8), m_total))
    # v7x megacore: keep >=2 grid steps whenever possible so ("parallel",)
    # actually splits row tiles across both TensorCores.
    if pl.cdiv(m_total, tile_m) < 2 and m_total >= 16:
        tile_m = _round_up(pl.cdiv(m_total, 2), 8)
    grid = (pl.cdiv(m_total, tile_m),)         # partial last block handled by Pallas
    n_pad = m_total * 128

    # Layout plumbing: features -> leading axis, rows -> (M, 128) lane-dense slabs.
    # allow_input_fusion below lets XLA fuse this transpose/pad/reshape into the
    # pallas_call operand instead of writing a second full-size array to HBM.
    xt = jnp.transpose(x2d, (1, 0))            # (3, N)
    xt = jnp.pad(xt, ((0, 0), (0, n_pad - n))) # (3, n_pad)
    xt = xt.reshape(3, m_total, 128)

    bytes_accessed = 3 * n_pad * xt.dtype.itemsize + 4 * n_pad
    cost = pl.CostEstimate(flops=6 * n_pad, transcendentals=0,
                           bytes_accessed=bytes_accessed)

    out = pl.pallas_call(
        fused_affine_kernel,
        out_shape=jax.ShapeDtypeStruct((m_total, 128), jnp.float32),
        grid=grid,
        in_specs=[
            pl.BlockSpec((3, tile_m, 128), lambda i: (0, i, 0)),
            pl.BlockSpec(memory_space=pltpu.MemorySpace.SMEM),   # 4 fused scalars
        ],
        out_specs=pl.BlockSpec((tile_m, 128), lambda i: (i, 0)),
        compiler_params=pltpu.CompilerParams(
            dimension_semantics=("parallel",),        # shard row tiles across TCs (v7x)
            allow_input_fusion=[True, False],         # fuse transpose/pad into operand
        ),
        cost_estimate=cost,
    )(xt, wb)

    # Tail slice (valid rows only). Cheap relative to the kernel; XLA fuses the
    # reshape with the slice.
    return out.reshape(-1)[:n].reshape(n, 1)


@jax.jit
def forward(x, params):
    """Matches LSTM.forward(x): returns linear4(linear3(linear1(linear(x))))."""
    # Fold the activation-free chain 3 -> 10 -> 8 -> 2 -> 1 into one affine map.
    w_f = params["w"] @ params["w1"] @ params["w3"] @ params["w4"]            # (3, 1)
    b_f = (((params["b"] @ params["w1"] + params["b1"]) @ params["w3"]
            + params["b3"]) @ params["w4"] + params["b4"])                    # (1, 1)
    wb = jnp.concatenate([w_f.reshape(3), b_f.reshape(1)]).astype(jnp.float32)

    # NOTE: the module's LSTM branch (self.lstm + linear4 on its hidden states)
    # is dead code in the PyTorch forward — its result never reaches the
    # returned value — so it is intentionally not computed here.
    x2d = x.reshape(-1, x.shape[-1])
    if x2d.dtype not in (jnp.bfloat16, jnp.float32):
        x2d = x2d.astype(jnp.float32)        # keep bf16/f32 native, widen in-kernel
    out = fused_mlp_forward(x2d, wb)
    return out.reshape(x.shape[:-1] + (1,))


# ----------------------------------------------------------------------------
# Deterministic parameter init (PyTorch-style uniform(-1/sqrt(fan_in), +...)).
# Linear weights are stored transposed as (in, out): y = x @ W + b.
# ----------------------------------------------------------------------------
def init_params(key):
    def u(k, shape, bound):
        return jax.random.uniform(k, shape, jnp.float32, -bound, bound)

    def lin(ka, kb, fin, fout):
        bound = 1.0 / math.sqrt(fin)
        return u(ka, (fin, fout), bound), u(kb, (1, fout), bound)

    ks = jax.random.split(key, 8)
    p = {}
    p["w"], p["b"] = lin(ks[0], ks[1], 3, 10)       # self.linear
    p["w1"], p["b1"] = lin(ks[2], ks[3], 10, 8)     # self.linear1
    p["w3"], p["b3"] = lin(ks[4], ks[5], 8, 2)      # self.linear3
    p["w4"], p["b4"] = lin(ks[6], ks[7], 2, 1)      # self.linear4
    return p


def _reference(x2d, p):
    h = x2d @ p["w"] + p["b"]
    h = h @ p["w1"] + p["b1"]
    h = h @ p["w3"] + p["b3"]
    return h @ p["w4"] + p["b4"]


if __name__ == "__main__":
    key = jax.random.PRNGKey(0)
    k_param, k_x = jax.random.split(key)
    params = init_params(k_param)

    # Small input consistent with the module: last dim must be 3 (fan-in of
    # self.linear) and numel divisible by 3 (the module's reshape(-1, 3, 1)).
    x = jax.random.normal(k_x, (64, 3), jnp.float32)

    out = forward(x, params)
    jax.block_until_ready(out)

    assert out.shape == (64, 1), out.shape
    ref = _reference(x.reshape(-1, 3), params).reshape(64, 1)
    assert jnp.allclose(out, ref, rtol=1e-3, atol=1e-4), (
        "mismatch vs JAX reference; max abs err = "
        + str(float(jnp.max(jnp.abs(out - ref)))))

    print("KERNEL_OK")
</pallas_src>

<mosaic_0001>
module attributes {stable_mosaic.version = 11 : i64} {
  func.func @fused_affine_kernel(%arg0: i32, %arg1: memref<3x8x128xf32, #tpu.memory_space<vmem>>, %arg2: memref<4xf32, #tpu.memory_space<smem>>, %arg3: memref<8x128xf32, #tpu.memory_space<vmem>>) attributes {dimension_semantics = [#tpu.dimension_semantics<parallel>], iteration_bounds = array<i64: 1>, scalar_prefetch = 0 : i64, scratch_operands = 0 : i64, tpu.core_type = #tpu.core_type<tc>, window_params = [{transform_indices = @transform_0, window_bounds = array<i64: 3, 8, 128>}, {transform_indices = @transform_1, window_bounds = array<i64: 4>}, {transform_indices = @transform_2, window_bounds = array<i64: 8, 128>}]} {
    %c0 = arith.constant 0 : index
    %c0_0 = arith.constant 0 : index
    %c0_1 = arith.constant 0 : index
    %0 = vector.load %arg1[%c0, %c0_0, %c0_1] : memref<3x8x128xf32, #tpu.memory_space<vmem>>, vector<1x8x128xf32>
    %1 = vector.shape_cast %0 : vector<1x8x128xf32> to vector<8x128xf32>
    %c1 = arith.constant 1 : index
    %c0_2 = arith.constant 0 : index
    %c0_3 = arith.constant 0 : index
    %2 = vector.load %arg1[%c1, %c0_2, %c0_3] : memref<3x8x128xf32, #tpu.memory_space<vmem>>, vector<1x8x128xf32>
    %3 = vector.shape_cast %2 : vector<1x8x128xf32> to vector<8x128xf32>
    %c2 = arith.constant 2 : index
    %c0_4 = arith.constant 0 : index
    %c0_5 = arith.constant 0 : index
    %4 = vector.load %arg1[%c2, %c0_4, %c0_5] : memref<3x8x128xf32, #tpu.memory_space<vmem>>, vector<1x8x128xf32>
    %5 = vector.shape_cast %4 : vector<1x8x128xf32> to vector<8x128xf32>
    %c0_6 = arith.constant 0 : index
    %6 = memref.load %arg2[%c0_6] : memref<4xf32, #tpu.memory_space<smem>>
    %7 = vector.broadcast %6 : f32 to vector<8x128xf32>
    %8 = arith.mulf %1, %7 : vector<8x128xf32>
    %c1_7 = arith.constant 1 : index
    %9 = memref.load %arg2[%c1_7] : memref<4xf32, #tpu.memory_space<smem>>
    %10 = vector.broadcast %9 : f32 to vector<8x128xf32>
    %11 = arith.mulf %3, %10 : vector<8x128xf32>
    %12 = arith.addf %8, %11 : vector<8x128xf32>
    %c2_8 = arith.constant 2 : index
    %13 = memref.load %arg2[%c2_8] : memref<4xf32, #tpu.memory_space<smem>>
    %14 = vector.broadcast %13 : f32 to vector<8x128xf32>
    %15 = arith.mulf %5, %14 : vector<8x128xf32>
    %16 = arith.addf %12, %15 : vector<8x128xf32>
    %c3 = arith.constant 3 : index
    %17 = memref.load %arg2[%c3] : memref<4xf32, #tpu.memory_space<smem>>
    %18 = vector.broadcast %17 : f32 to vector<8x128xf32>
    %19 = arith.addf %16, %18 : vector<8x128xf32>
    %c0_9 = arith.constant 0 : index
    %c0_10 = arith.constant 0 : index
    %20 = vector.load %arg3[%c0_9, %c0_10] : memref<8x128xf32, #tpu.memory_space<vmem>>, vector<8x128xf32>
    tpu.vector_store %arg3[%c0_9, %c0_10], %19 {strides = array<i32>} : memref<8x128xf32, #tpu.memory_space<vmem>>, vector<8x128xf32>,
    return
  }
  func.func @transform_0(%arg0: i32) -> (i32, i32, i32) {
    %c0_i32 = arith.constant 0 : i32
    %c0_i32_0 = arith.constant 0 : i32
    %c0_i32_1 = arith.constant 0 : i32
    return %c0_i32, %arg0, %c0_i32_0 : i32, i32, i32
  }
  func.func @transform_1(%arg0: i32) -> i32 {
    %c0_i32 = arith.constant 0 : i32
    %c0_i32_0 = arith.constant 0 : i32
    return %c0_i32 : i32
  }
  func.func @transform_2(%arg0: i32) -> (i32, i32) {
    %c0_i32 = arith.constant 0 : i32
    %c0_i32_0 = arith.constant 0 : i32
    return %arg0, %c0_i32 : i32, i32
  }
}

</mosaic_0001>

<bundles_post_ra>
// kernel: forward.2
= control target key start
LH: loop header
LB: loop body
LE: loop exit
PB: predicated region body
PF: predicated region fallthrough
CT: control target
= control target key end

     0   :  { %7 = vsyncpa [#allocation3], 0  ;;  %s85_s12 = smov [#allocation2]   ;;  %s116_s0 = inlined_call_operand.vmem [shape: f32[4], index: 0, kind: input, shape index: {}]   ;;  %s117_s1 = inlined_call_operand.vmem [shape: f32[1,3,8,128], index: 1, kind: input, shape index: {}]   ;;  %s118_s2 = inlined_call_operand.vmem [shape: f32[8,128], index: 2, kind: output, shape index: {}]  }
   0x1   :  { %s15_s11 = sshll.u32 %s116_s0, 4  ;;  %s16_s11 = int_to_ptr.vmem [resolvable:$true] %s15_s11 }
   0x2   :  { %18 = dma.vmem_to_smem %s16_s11, 16, %s85_s12, [#allocation3]  }
   0x3   :  { %83 = dma.done.wait [#allocation3], 16  }
   0x4   :  { %84 = vsyncadd [#allocation3], 4294967280 }
   0x5   :  { %23 = sfence }
   0x6   :  { %s45_s13 = sld [smem:[#allocation2]]  ;;  %v24_v0 = vld [vmem:[%s117_s1] sm:$0xff]  ;;  %v65_v1 = vld [vmem:[%s117_s1 + $0x8] sm:$0xff]  ;;  %v66_v2 = vld [vmem:[%s117_s1 + $0x10] sm:$0xff] }
   0x7   :  { %s67_s14 = sld [smem:[#allocation2 + $0x1]] }
   0x8   :  { %s68_s15 = sld [smem:[#allocation2 + $0x2]] }
   0x9   :  { %s69_s16 = sld [smem:[#allocation2 + $0x3]] }
   0xc   :  { %v46_v3 = vstv %s45_s13 }
   0xd   :  { %v47_v4 = vmul.f32 %v46_v3, %v24_v0  ;;  %v49_v5 = vstv %s67_s14 }
   0xe   :  { %v50_v6 = vmul.f32 %v65_v1, %v49_v5  ;;  %v53_v7 = vstv %s68_s15 }
   0xf   :  { %v54_v8 = vmul.f32 %v66_v2, %v53_v7  ;;  %v57_v10 = vstv %s69_s16 }
  0x10   :  { %v51_v9 = vadd.f32 %v50_v6, %v47_v4 }
  0x12   :  { %v55_v11 = vadd.f32 %v54_v8, %v51_v9 }
  0x14   :  { %v58_v12 = vadd.f32 %v57_v10, %v55_v11 }
  0x16   :  { %59 = vst [vmem:[%s118_s2] sm:$0xff] %v58_v12 }
  0x17   :  { %64 = vsyncpa [#allocation3], 1 }

</bundles_post_ra>
